<compile_context>
chip_gen: v7x
topology: tpu7x:2x2x1
jax: 0.10.0
libtpu: 0.0.40
codegen_flags: <defaults>
</compile_context>

<pallas_src>
import jax
import jax.numpy as jnp
from jax.experimental import pallas as pl
from jax.experimental.pallas import tpu as pltpu

EPS = 1e-6
TEMPERATURE = 1.0


def _mix_of_layer_kernel(x_ref, mask_ref, wcomb_ref, gb_ref, out_ref, acc_ref):
    si = pl.program_id(1)

    @pl.when(si == 0)
    def _():
        acc_ref[...] = jnp.zeros_like(acc_ref)

    # Masked partial sum over this sequence tile, accumulated in f32.
    # The mask relayout to (bt, st, 1) is tiny (~bt*st elems) and then only
    # broadcasts along lanes (H); working per group g bounds the f32 temporary
    # to (bt, st, H) instead of the whole (bt, G, st, H) block.
    m = mask_ref[...].astype(jnp.float32)[:, :, None]            # (bt, st, 1)
    G = acc_ref.shape[1]
    for g in range(G):  # static unroll; G is small
        xg = x_ref[:, g, :, :].astype(jnp.float32)               # (bt, st, H)
        acc_ref[:, g, :] += jnp.sum(xg * m, axis=1)              # (bt, H)

    @pl.when(si == pl.num_programs(1) - 1)
    def _():
        v = acc_ref[...]                                               # (bt, G, H)
        inv_rms = jax.lax.rsqrt(jnp.mean(v * v, axis=-1) + EPS)        # (bt, G)
        wsum = jnp.sum(v * wcomb_ref[...][None, :, :], axis=-1)        # (bt, G)
        logits = inv_rms * wsum + gb_ref[0]                            # (bt, G)
        mx = jnp.max(logits, axis=-1, keepdims=True)
        e = jnp.exp(logits - mx)
        out_ref[...] = (e / jnp.sum(e, axis=-1, keepdims=True)).astype(out_ref.dtype)


def _pick_tile(dim, unit, max_tile):
    """Pick (tile, padded_dim): `tile` divides `padded_dim`, respects `max_tile`
    (never silently exceeds it), and is either the full dim or a multiple of
    `unit` (TPU (8,128) rule).  If no exact divisor exists, the dim is padded
    up (rare fallback; padded rows/cols are zero and never contribute)."""
    max_tile = max(unit, max_tile)
    if dim <= max_tile:
        return dim, dim
    t = (max_tile // unit) * unit
    while t >= unit:
        if dim % t == 0:
            return t, dim
        t -= unit
    t = (max_tile // unit) * unit
    padded = ((dim + t - 1) // t) * t
    return t, padded


def _vmem_budgets():
    """Per-generation VMEM limits: 128 MiB physical on v5e/v6e, 64 MiB on v7x."""
    cap = 64 << 20  # conservative (v7x-safe) default
    try:
        info = pltpu.get_tpu_info()
        cap = int(getattr(info, "vmem_capacity_bytes", cap) or cap)
    except Exception:
        pass
    vmem_limit = min(96 << 20, (cap * 3) // 4)          # 96 MiB (v5e/v6e), 48 MiB (v7x)
    block_budget = max(4 << 20, vmem_limit // 4)        # 24 MiB (v5e/v6e), 12 MiB (v7x)
    return vmem_limit, block_budget


def s_mix_of_layer(x, mask, rms_weight, gate_w, gate_b,
                   temperature=TEMPERATURE, block_budget_bytes=None,
                   vmem_limit_bytes=None):
    """x: (B, G, S, H), mask: (B, S), rms_weight/gate_w: (H,), gate_b: scalar."""
    B, G, S, H = x.shape
    auto_limit, auto_budget = _vmem_budgets()
    vmem_limit = int(vmem_limit_bytes or auto_limit)
    budget = int(block_budget_bytes or auto_budget)
    itemsize = jnp.dtype(x.dtype).itemsize

    # Tile selection: maximize s_tile first (contiguous DMA, fewer grid steps),
    # then size b_tile from the leftover budget.  Keep >= 2 blocks on the
    # parallel B axis when B >= 16 so both v7x TensorCores engage.
    b_min = B if B <= 8 else 8
    s_cap = max(128, budget // max(1, b_min * G * H * itemsize))
    s_tile, S_pad = _pick_tile(S, 128, s_cap)
    b_cap = max(8, budget // max(1, G * s_tile * H * itemsize))
    if B >= 16:
        b_cap = min(b_cap, B // 2)
    b_tile, B_pad = _pick_tile(B, 8, b_cap)

    if (B_pad, S_pad) != (B, S):
        # TODO(synk): rare fallback for shapes with no (8,128)-friendly divisor;
        # zero-padding costs one extra HBM copy of x but keeps semantics exact
        # (padded mask rows are zero so they never contribute to the sum).
        x = jnp.pad(x, ((0, B_pad - B), (0, 0), (0, S_pad - S), (0, 0)))
        mask = jnp.pad(mask, ((0, B_pad - B), (0, S_pad - S)))

    grid = (B_pad // b_tile, S_pad // s_tile)

    # Fused epilogue constants (elementwise scales commute with the dot).
    inv_t = 1.0 / (float(temperature) + 1e-6)
    w_comb = (jnp.asarray(rms_weight, jnp.float32)
              * jnp.asarray(gate_w, jnp.float32) * inv_t).reshape(1, H)
    gb = (jnp.asarray(gate_b, jnp.float32) * inv_t).reshape(1)

    out = pl.pallas_call(
        _mix_of_layer_kernel,
        out_shape=jax.ShapeDtypeStruct((B_pad, G), jnp.float32),
        grid=grid,
        in_specs=[
            pl.BlockSpec((b_tile, G, s_tile, H), lambda bi, si: (bi, 0, si, 0)),
            pl.BlockSpec((b_tile, s_tile), lambda bi, si: (bi, si)),
            pl.BlockSpec((1, H), lambda bi, si: (0, 0)),
            pl.BlockSpec(memory_space=pltpu.MemorySpace.SMEM),
        ],
        out_specs=pl.BlockSpec((b_tile, G), lambda bi, si: (bi, 0)),
        scratch_shapes=[pltpu.VMEM((b_tile, G, H), jnp.float32)],
        compiler_params=pltpu.CompilerParams(
            dimension_semantics=("parallel", "arbitrary"),
            vmem_limit_bytes=vmem_limit,
        ),
    )(x, mask, w_comb, gb)
    return out[:B] if B_pad != B else out


def _reference(x, mask, rms_weight, gate_w, gate_b, temperature=TEMPERATURE):
    xf = x.astype(jnp.float32)
    mf = mask.astype(jnp.float32)
    v = jnp.sum(xf * mf[:, None, :, None], axis=2)
    var = jnp.mean(v * v, axis=-1, keepdims=True)
    v = rms_weight * (v * jax.lax.rsqrt(var + EPS))
    logits = jnp.einsum("bgh,h->bg", v, gate_w) + gate_b
    logits = logits / (temperature + 1e-6)
    return jax.nn.softmax(logits, axis=-1)


def _run_case(key, B, G, S, H, dtype=jnp.float32, block_budget_bytes=None,
              atol=1e-5):
    k1, k2, k3, k4 = jax.random.split(key, 4)

    # v_tensor_groups: G tensors of shape (B, S, H), pre-stacked into (B, G, S, H)
    x = jax.random.normal(k1, (B, G, S, H), dtype=jnp.float32).astype(dtype)
    lens = jax.random.randint(k4, (B, 1), 1, S + 1)
    mask = (jnp.arange(S)[None, :] < lens).astype(dtype)

    rms_weight = jnp.ones((H,), dtype=jnp.float32)        # torch RMSNorm init
    bound = 1.0 / (H ** 0.5)
    gate_w = jax.random.uniform(k2, (H,), minval=-bound, maxval=bound,
                                dtype=jnp.float32)
    gate_b = jax.random.uniform(k3, (), minval=-bound, maxval=bound,
                                dtype=jnp.float32)

    out = s_mix_of_layer(x, mask, rms_weight, gate_w, gate_b,
                         block_budget_bytes=block_budget_bytes)
    out = jax.block_until_ready(out)

    ref = _reference(x, mask, rms_weight, gate_w, gate_b)
    assert out.shape == (B, G)
    assert jnp.allclose(out, ref, atol=atol, rtol=1e-4), (out, ref)
    assert jnp.allclose(jnp.sum(out, axis=-1), 1.0, atol=1e-4)


if __name__ == "__main__":
    key = jax.random.PRNGKey(0)
    k_small, k_big, k_bf16 = jax.random.split(key, 3)

    # Spec-sized small case: grid collapses to (1, 1).
    _run_case(k_small, B=2, G=4, S=8, H=32)

    # Larger case with a deliberately tiny block budget to exercise the
    # (B-tile, S-tile) streaming grid + accumulator path (grid = (2, 2)),
    # including >=2 blocks on the parallel B axis (v7x megacore path).
    _run_case(k_big, B=16, G=4, S=256, H=128, block_budget_bytes=1 << 19)

    # bf16-streamed inputs (f32 accumulation/output), default per-gen budgets.
    _run_case(k_bf16, B=8, G=4, S=128, H=128, dtype=jnp.bfloat16, atol=1e-4)

    print("KERNEL_OK")
</pallas_src>

<mosaic_0001>
module attributes {stable_mosaic.version = 11 : i64} {
  func.func @_mix_of_layer_kernel(%arg0: i32, %arg1: i32, %arg2: memref<2x4x8x32xf32, #tpu.memory_space<vmem>>, %arg3: memref<2x8xf32, #tpu.memory_space<vmem>>, %arg4: memref<1x32xf32, #tpu.memory_space<vmem>>, %arg5: memref<1xf32, #tpu.memory_space<smem>>, %arg6: memref<2x4xf32, #tpu.memory_space<vmem>>, %arg7: memref<2x4x32xf32, #tpu.memory_space<vmem>>) attributes {dimension_semantics = [#tpu.dimension_semantics<parallel>, #tpu.dimension_semantics<arbitrary>], iteration_bounds = array<i64: 1, 1>, scalar_prefetch = 0 : i64, scratch_operands = 1 : i64, tpu.core_type = #tpu.core_type<tc>, window_params = [{transform_indices = @transform_0, window_bounds = array<i64: 2, 4, 8, 32>}, {transform_indices = @transform_1, window_bounds = array<i64: 2, 8>}, {pipeline_mode = #tpu.pipeline_mode<synchronous>, transform_indices = @transform_2, window_bounds = array<i64: 1, 32>}, {transform_indices = @transform_3, window_bounds = array<i64: 1>}, {transform_indices = @transform_4, window_bounds = array<i64: 2, 4>}]} {
    %c0_i32 = arith.constant 0 : i32
    %0 = arith.cmpi eq, %arg1, %c0_i32 : i32
    %1 = arith.extui %0 : i1 to i32
    %c0_i32_0 = arith.constant 0 : i32
    %2 = arith.cmpi ne, %1, %c0_i32_0 : i32
    scf.if %2 {
      %cst_44 = arith.constant 0.000000e+00 : f32
      %52 = vector.broadcast %cst_44 : f32 to vector<2x4x32xf32>
      %c0_45 = arith.constant 0 : index
      %c0_46 = arith.constant 0 : index
      %c0_47 = arith.constant 0 : index
      %53 = vector.load %arg7[%c0_45, %c0_46, %c0_47] : memref<2x4x32xf32, #tpu.memory_space<vmem>>, vector<2x4x32xf32>
      tpu.vector_store %arg7[%c0_45, %c0_46, %c0_47], %52 {strides = array<i32>} : memref<2x4x32xf32, #tpu.memory_space<vmem>>, vector<2x4x32xf32>,
    } else {
    }
    %c0 = arith.constant 0 : index
    %c0_1 = arith.constant 0 : index
    %3 = vector.load %arg3[%c0, %c0_1] : memref<2x8xf32, #tpu.memory_space<vmem>>, vector<2x8xf32>
    %4 = vector.shape_cast %3 : vector<2x8xf32> to vector<2x8x1xf32>
    %c0_2 = arith.constant 0 : index
    %c0_3 = arith.constant 0 : index
    %c0_4 = arith.constant 0 : index
    %c0_5 = arith.constant 0 : index
    %5 = vector.load %arg2[%c0_2, %c0_3, %c0_4, %c0_5] : memref<2x4x8x32xf32, #tpu.memory_space<vmem>>, vector<2x1x8x32xf32>
    %6 = vector.shape_cast %5 : vector<2x1x8x32xf32> to vector<2x8x32xf32>
    %c0_6 = arith.constant 0 : index
    %c0_7 = arith.constant 0 : index
    %c0_8 = arith.constant 0 : index
    %7 = vector.load %arg7[%c0_6, %c0_7, %c0_8] : memref<2x4x32xf32, #tpu.memory_space<vmem>>, vector<2x1x32xf32>
    %8 = vector.shape_cast %7 : vector<2x1x32xf32> to vector<2x32xf32>
    %9 = vector.broadcast %4 : vector<2x8x1xf32> to vector<2x8x32xf32>
    %10 = arith.mulf %6, %9 : vector<2x8x32xf32>
    %cst = arith.constant dense<0.000000e+00> : vector<2x32xf32>
    %11 = vector.multi_reduction <add>, %10, %cst [1] : vector<2x8x32xf32> to vector<2x32xf32>
    %12 = arith.addf %8, %11 : vector<2x32xf32>
    %c0_9 = arith.constant 0 : index
    %c0_10 = arith.constant 0 : index
    %c0_11 = arith.constant 0 : index
    %13 = vector.load %arg7[%c0_9, %c0_10, %c0_11] : memref<2x4x32xf32, #tpu.memory_space<vmem>>, vector<2x1x32xf32>
    %14 = vector.shape_cast %13 : vector<2x1x32xf32> to vector<2x32xf32>
    %15 = vector.shape_cast %12 : vector<2x32xf32> to vector<2x1x32xf32>
    tpu.vector_store %arg7[%c0_9, %c0_10, %c0_11], %15 {strides = array<i32>} : memref<2x4x32xf32, #tpu.memory_space<vmem>>, vector<2x1x32xf32>,
    %c0_12 = arith.constant 0 : index
    %c1 = arith.constant 1 : index
    %c0_13 = arith.constant 0 : index
    %c0_14 = arith.constant 0 : index
    %16 = vector.load %arg2[%c0_12, %c1, %c0_13, %c0_14] : memref<2x4x8x32xf32, #tpu.memory_space<vmem>>, vector<2x1x8x32xf32>
    %17 = vector.shape_cast %16 : vector<2x1x8x32xf32> to vector<2x8x32xf32>
    %c0_15 = arith.constant 0 : index
    %c1_16 = arith.constant 1 : index
    %c0_17 = arith.constant 0 : index
    %18 = vector.load %arg7[%c0_15, %c1_16, %c0_17] : memref<2x4x32xf32, #tpu.memory_space<vmem>>, vector<2x1x32xf32>
    %19 = vector.shape_cast %18 : vector<2x1x32xf32> to vector<2x32xf32>
    %20 = vector.broadcast %4 : vector<2x8x1xf32> to vector<2x8x32xf32>
    %21 = arith.mulf %17, %20 : vector<2x8x32xf32>
    %cst_18 = arith.constant dense<0.000000e+00> : vector<2x32xf32>
    %22 = vector.multi_reduction <add>, %21, %cst_18 [1] : vector<2x8x32xf32> to vector<2x32xf32>
    %23 = arith.addf %19, %22 : vector<2x32xf32>
    %c0_19 = arith.constant 0 : index
    %c1_20 = arith.constant 1 : index
    %c0_21 = arith.constant 0 : index
    %24 = vector.load %arg7[%c0_19, %c1_20, %c0_21] : memref<2x4x32xf32, #tpu.memory_space<vmem>>, vector<2x1x32xf32>
    %25 = vector.shape_cast %24 : vector<2x1x32xf32> to vector<2x32xf32>
    %26 = vector.shape_cast %23 : vector<2x32xf32> to vector<2x1x32xf32>
    tpu.vector_store %arg7[%c0_19, %c1_20, %c0_21], %26 {strides = array<i32>} : memref<2x4x32xf32, #tpu.memory_space<vmem>>, vector<2x1x32xf32>,
    %c0_22 = arith.constant 0 : index
    %c2 = arith.constant 2 : index
    %c0_23 = arith.constant 0 : index
    %c0_24 = arith.constant 0 : index
    %27 = vector.load %arg2[%c0_22, %c2, %c0_23, %c0_24] : memref<2x4x8x32xf32, #tpu.memory_space<vmem>>, vector<2x1x8x32xf32>
    %28 = vector.shape_cast %27 : vector<2x1x8x32xf32> to vector<2x8x32xf32>
    %c0_25 = arith.constant 0 : index
    %c2_26 = arith.constant 2 : index
    %c0_27 = arith.constant 0 : index
    %29 = vector.load %arg7[%c0_25, %c2_26, %c0_27] : memref<2x4x32xf32, #tpu.memory_space<vmem>>, vector<2x1x32xf32>
    %30 = vector.shape_cast %29 : vector<2x1x32xf32> to vector<2x32xf32>
    %31 = vector.broadcast %4 : vector<2x8x1xf32> to vector<2x8x32xf32>
    %32 = arith.mulf %28, %31 : vector<2x8x32xf32>
    %cst_28 = arith.constant dense<0.000000e+00> : vector<2x32xf32>
    %33 = vector.multi_reduction <add>, %32, %cst_28 [1] : vector<2x8x32xf32> to vector<2x32xf32>
    %34 = arith.addf %30, %33 : vector<2x32xf32>
    %c0_29 = arith.constant 0 : index
    %c2_30 = arith.constant 2 : index
    %c0_31 = arith.constant 0 : index
    %35 = vector.load %arg7[%c0_29, %c2_30, %c0_31] : memref<2x4x32xf32, #tpu.memory_space<vmem>>, vector<2x1x32xf32>
    %36 = vector.shape_cast %35 : vector<2x1x32xf32> to vector<2x32xf32>
    %37 = vector.shape_cast %34 : vector<2x32xf32> to vector<2x1x32xf32>
    tpu.vector_store %arg7[%c0_29, %c2_30, %c0_31], %37 {strides = array<i32>} : memref<2x4x32xf32, #tpu.memory_space<vmem>>, vector<2x1x32xf32>,
    %c0_32 = arith.constant 0 : index
    %c3 = arith.constant 3 : index
    %c0_33 = arith.constant 0 : index
    %c0_34 = arith.constant 0 : index
    %38 = vector.load %arg2[%c0_32, %c3, %c0_33, %c0_34] : memref<2x4x8x32xf32, #tpu.memory_space<vmem>>, vector<2x1x8x32xf32>
    %39 = vector.shape_cast %38 : vector<2x1x8x32xf32> to vector<2x8x32xf32>
    %c0_35 = arith.constant 0 : index
    %c3_36 = arith.constant 3 : index
    %c0_37 = arith.constant 0 : index
    %40 = vector.load %arg7[%c0_35, %c3_36, %c0_37] : memref<2x4x32xf32, #tpu.memory_space<vmem>>, vector<2x1x32xf32>
    %41 = vector.shape_cast %40 : vector<2x1x32xf32> to vector<2x32xf32>
    %42 = vector.broadcast %4 : vector<2x8x1xf32> to vector<2x8x32xf32>
    %43 = arith.mulf %39, %42 : vector<2x8x32xf32>
    %cst_38 = arith.constant dense<0.000000e+00> : vector<2x32xf32>
    %44 = vector.multi_reduction <add>, %43, %cst_38 [1] : vector<2x8x32xf32> to vector<2x32xf32>
    %45 = arith.addf %41, %44 : vector<2x32xf32>
    %c0_39 = arith.constant 0 : index
    %c3_40 = arith.constant 3 : index
    %c0_41 = arith.constant 0 : index
    %46 = vector.load %arg7[%c0_39, %c3_40, %c0_41] : memref<2x4x32xf32, #tpu.memory_space<vmem>>, vector<2x1x32xf32>
    %47 = vector.shape_cast %46 : vector<2x1x32xf32> to vector<2x32xf32>
    %48 = vector.shape_cast %45 : vector<2x32xf32> to vector<2x1x32xf32>
    tpu.vector_store %arg7[%c0_39, %c3_40, %c0_41], %48 {strides = array<i32>} : memref<2x4x32xf32, #tpu.memory_space<vmem>>, vector<2x1x32xf32>,
    %c0_i32_42 = arith.constant 0 : i32
    %49 = arith.cmpi eq, %arg1, %c0_i32_42 : i32
    %50 = arith.extui %49 : i1 to i32
    %c0_i32_43 = arith.constant 0 : i32
    %51 = arith.cmpi ne, %50, %c0_i32_43 : i32
    scf.if %51 {
      %c0_44 = arith.constant 0 : index
      %c0_45 = arith.constant 0 : index
      %c0_46 = arith.constant 0 : index
      %52 = vector.load %arg7[%c0_44, %c0_45, %c0_46] : memref<2x4x32xf32, #tpu.memory_space<vmem>>, vector<2x4x32xf32>
      %53 = arith.mulf %52, %52 : vector<2x4x32xf32>
      %cst_47 = arith.constant dense<0.000000e+00> : vector<2x4xf32>
      %54 = vector.multi_reduction <add>, %53, %cst_47 [2] : vector<2x4x32xf32> to vector<2x4xf32>
      %cst_48 = arith.constant 3.200000e+01 : f32
      %55 = vector.broadcast %cst_48 : f32 to vector<2x4xf32>
      %56 = arith.divf %54, %55 : vector<2x4xf32>
      %cst_49 = arith.constant 9.99999997E-7 : f32
      %57 = vector.broadcast %cst_49 : f32 to vector<2x4xf32>
      %58 = arith.addf %56, %57 : vector<2x4xf32>
      %59 = math.rsqrt %58 : vector<2x4xf32>
      %c0_50 = arith.constant 0 : index
      %c0_51 = arith.constant 0 : index
      %60 = vector.load %arg4[%c0_50, %c0_51] : memref<1x32xf32, #tpu.memory_space<vmem>>, vector<1x32xf32>
      %61 = vector.shape_cast %60 : vector<1x32xf32> to vector<1x1x32xf32>
      %62 = vector.broadcast %61 : vector<1x1x32xf32> to vector<2x4x32xf32>
      %63 = arith.mulf %52, %62 : vector<2x4x32xf32>
      %cst_52 = arith.constant dense<0.000000e+00> : vector<2x4xf32>
      %64 = vector.multi_reduction <add>, %63, %cst_52 [2] : vector<2x4x32xf32> to vector<2x4xf32>
      %65 = arith.mulf %59, %64 : vector<2x4xf32>
      %c0_53 = arith.constant 0 : index
      %66 = memref.load %arg5[%c0_53] : memref<1xf32, #tpu.memory_space<smem>>
      %67 = vector.broadcast %66 : f32 to vector<2x4xf32>
      %68 = arith.addf %65, %67 : vector<2x4xf32>
      %cst_54 = arith.constant dense<0xFF800000> : vector<2xf32>
      %69 = vector.multi_reduction <maximumf>, %68, %cst_54 [1] : vector<2x4xf32> to vector<2xf32>
      %70 = vector.shape_cast %69 : vector<2xf32> to vector<2x1xf32>
      %71 = vector.broadcast %70 : vector<2x1xf32> to vector<2x4xf32>
      %72 = arith.subf %68, %71 : vector<2x4xf32>
      %73 = math.exp %72 : vector<2x4xf32>
      %cst_55 = arith.constant dense<0.000000e+00> : vector<2xf32>
      %74 = vector.multi_reduction <add>, %73, %cst_55 [1] : vector<2x4xf32> to vector<2xf32>
      %75 = vector.shape_cast %74 : vector<2xf32> to vector<2x1xf32>
      %76 = vector.broadcast %75 : vector<2x1xf32> to vector<2x4xf32>
      %77 = arith.divf %73, %76 : vector<2x4xf32>
      %c0_56 = arith.constant 0 : index
      %c0_57 = arith.constant 0 : index
      %78 = vector.load %arg6[%c0_56, %c0_57] : memref<2x4xf32, #tpu.memory_space<vmem>>, vector<2x4xf32>
      tpu.vector_store %arg6[%c0_56, %c0_57], %77 {strides = array<i32>} : memref<2x4xf32, #tpu.memory_space<vmem>>, vector<2x4xf32>,
    } else {
    }
    return
  }
  func.func @transform_0(%arg0: i32, %arg1: i32) -> (i32, i32, i32, i32) {
    %c0_i32 = arith.constant 0 : i32
    %c0_i32_0 = arith.constant 0 : i32
    %c0_i32_1 = arith.constant 0 : i32
    return %arg0, %c0_i32, %arg1, %c0_i32_0 : i32, i32, i32, i32
  }
  func.func @transform_1(%arg0: i32, %arg1: i32) -> (i32, i32) {
    %c0_i32 = arith.constant 0 : i32
    return %arg0, %arg1 : i32, i32
  }
  func.func @transform_2(%arg0: i32, %arg1: i32) -> (i32, i32) {
    %c0_i32 = arith.constant 0 : i32
    %c0_i32_0 = arith.constant 0 : i32
    %c0_i32_1 = arith.constant 0 : i32
    return %c0_i32, %c0_i32_0 : i32, i32
  }
  func.func @transform_3(%arg0: i32, %arg1: i32) -> i32 {
    %c0_i32 = arith.constant 0 : i32
    %c0_i32_0 = arith.constant 0 : i32
    return %c0_i32 : i32
  }
  func.func @transform_4(%arg0: i32, %arg1: i32) -> (i32, i32) {
    %c0_i32 = arith.constant 0 : i32
    %c0_i32_0 = arith.constant 0 : i32
    return %arg0, %c0_i32 : i32, i32
  }
}

</mosaic_0001>

<bundles_post_ra>
// kernel: tpu_custom_call.1
= control target key start
LH: loop header
LB: loop body
LE: loop exit
PB: predicated region body
PF: predicated region fallthrough
CT: control target
= control target key end

     0   :  { %10 = vsyncpa [#allocation5], 0  ;;  %s483_s0 = inlined_call_operand.hbm [shape: f32[2,4,8,32], index: 0, kind: input, shape index: {}]   ;;  %s484_s1 = inlined_call_operand.vmem [shape: f32[2,8], index: 1, kind: input, shape index: {}]   ;;  %s485_s2 = inlined_call_operand.vmem [shape: f32[1,32], index: 2, kind: input, shape index: {}]   ;;  %s486_s3 = inlined_call_operand.<no memory space> [shape: f32[1], index: 3, kind: input, shape index: {}]   ;;  %s487_s4 = inlined_call_operand.hbm [shape: f32[2,4], index: 4, kind: output, shape index: {}]  }
   0x1   :  { %11 = vsyncpa [#allocation6], 0  ;;  %s373_s15 = smov [#allocation4]   ;;  %s325_s19 = scalar_lea.hbm %s483_s0, 1024 }
   0x2   :  { %s17_s16 = sshll.u32 %s373_s15, 4  ;;  %p326_p0 = scmp.ne.s32.totalorder %s483_s0, %s325_s19  ;;  %s18_s16 = int_to_ptr.vmem [resolvable:$true] %s17_s16 }
   0x3   :  { %p329_p1 = scmp.lt.u32.totalorder %s325_s19, %s483_s0 }
   0x5   :  { %p331_p2 = pnand %p329_p1, %p326_p0 }
   0x7   :  { %334 = shalt.err (!%p331_p2)
}
   0x8   :  { %s335_s24 = scalar_lea.vmem %s18_s16, 1024  ;;  %p340_p4 = scmp.lt.s32.totalorder %s18_s16, %s18_s16 }
   0x9   :  { %p336_p3 = scmp.ne.s32.totalorder %s18_s16, %s335_s24  ;;  %p341_p5 = scmp.lt.s32.totalorder %s335_s24, %s335_s24 }
   0xb   :  { %p342_p6 = por %p341_p5, %p340_p4 }
   0xd   :  { %p343_p7 = pnand %p342_p6, %p336_p3 }
   0xf   :  { %346 = shalt.err (!%p343_p7)
}
  0x10   :  { %s374_s25 = smov 128   ;;  %s375_s26 = smov 8  }
  0x11   :  { %23 = dma.hbm_to_vmem [thread:$0]  %s483_s0, 1024, %s18_s16, [#allocation5], %s374_s25, %s374_s25, %s375_s26  }
  0x12   :  { %369 = dma.done.wait [#allocation5], 1024  }
  0x13   :  { %370 = vsyncadd [#allocation5], 4294966272  ;;  %v41_v0 = vlaneseq  ;;  %vm37_vm0 = vcmask 257024   ;;  %v376_v6 = vmov 0.0   ;;  %v40_v7 = vld [vmem:[%s484_s1] sm:$0x3] }
  0x14   :  { %38 = vst.msk [vmem:[#allocation2] sm:$0xf] %vm37_vm0, %v376_v6  ;;  %39 = vst.msk [vmem:[#allocation2 + $0x4] sm:$0xf] %vm37_vm0, %v376_v6  ;;  %v55_v10 = vld [vmem:[#allocation4] sm:$0xff]  ;;  %v82_v11 = vld [vmem:[#allocation4 + $0x8] sm:$0xff] }
  0x15   :  { %v42_v1 = vshrl.u32 %v41_v0, 7  ;;  %v201_v2 = vand.u32 127, %v41_v0  ;;  %v107_v12 = vld [vmem:[#allocation4 + $0x10] sm:$0xff]  ;;  %v132_v13 = vld [vmem:[#allocation4 + $0x18] sm:$0xff]  ;;  %vm61_vm1 = vcmask 261120   ;;  %v56_v19 = vld [vmem:[#allocation4 + $0x20] sm:$0xff] }
  0x16   :  { %v83_v20 = vld [vmem:[#allocation4 + $0x28] sm:$0xff]  ;;  %v108_v21 = vld [vmem:[#allocation4 + $0x30] sm:$0xff]  ;;  %v133_v22 = vld [vmem:[#allocation4 + $0x38] sm:$0xff]  ;;  %vm78_vm2 = vcmask 253952   ;;  %vm210_vm3 = vcmask 1041409   ;;  %vm213_vm4 = vcmask 25600  }
  0x17   :  { %v416_v3 = vsub.s32 0, %v42_v1  ;;  %v418_v4 = vsub.s32 %v201_v2, %v42_v1  ;;  %v420_v5 = vsub.s32 1, %v42_v1 }
  0x19   :  { %v44_v8 = vrot.slane %v40_v7, %v416_v3  ;;  %v51_v9 = vrot.slane %v40_v7, %v420_v5 }
  0x1b   :  { %46 = vbcast.lane.b32.xlu0 %v44_v8, 256  ;;  %v57_v60 = vld [vmem:[#allocation2] sm:$0x1]  ;;  %v84_v61 = vld [vmem:[#allocation2 + $0x1] sm:$0x1] }
  0x1c   :  { %v109_v2 = vld [vmem:[#allocation2 + $0x2] sm:$0x1] }
  0x1f   :  { %53 = vbcast.lane.b32.xlu0 %v51_v9, 256 }
  0x8d   :  { %v47_v14 = vpop.permute.xlu0 %46 }
  0x8e   :  { %v59_v15 = vmul.f32 %v55_v10, %v47_v14  ;;  %v86_v16 = vmul.f32 %v82_v11, %v47_v14  ;;  %v111_v17 = vmul.f32 %v107_v12, %v47_v14  ;;  %v136_v18 = vmul.f32 %v132_v13, %v47_v14  ;;  %v134_v10 = vld [vmem:[#allocation2 + $0x3] sm:$0x1] }
  0x90   :  { %v62_v23 = vsel %vm61_vm1, %v59_v15, 0.0  ;;  %v88_v24 = vsel %vm61_vm1, %v86_v16, 0.0  ;;  %v113_v25 = vsel %vm61_vm1, %v111_v17, 0.0  ;;  %v138_v26 = vsel %vm61_vm1, %v136_v18, 0.0 }
  0x91   :  { %v63_v27 = vrot.slane %v62_v23, 4  ;;  %v89_v28 = vrot.slane %v88_v24, 4  ;;  %v114_v29 = vrot.slane %v113_v25, 4  ;;  %v139_v30 = vrot.slane %v138_v26, 4  ;;  %v54_v31 = vpop.permute.xlu0 %53 }
  0x92   :  { %v60_v32 = vmul.f32 %v56_v19, %v54_v31  ;;  %v87_v33 = vmul.f32 %v83_v20, %v54_v31  ;;  %v112_v34 = vmul.f32 %v108_v21, %v54_v31  ;;  %v137_v35 = vmul.f32 %v133_v22, %v54_v31 }
  0x93   :  { %v64_v36 = vadd.f32 %v63_v27, %v62_v23  ;;  %v90_v37 = vadd.f32 %v89_v28, %v88_v24  ;;  %v115_v38 = vadd.f32 %v114_v29, %v113_v25  ;;  %v140_v39 = vadd.f32 %v139_v30, %v138_v26  ;;  %v58_v27 = vld [vmem:[#allocation2 + $0x4] sm:$0x1]  ;;  %v85_v28 = vld [vmem:[#allocation2 + $0x5] sm:$0x1]  ;;  %v110_v29 = vld [vmem:[#allocation2 + $0x6] sm:$0x1] }
  0x94   :  { %v69_v40 = vsel %vm61_vm1, %v60_v32, 0.0  ;;  %v95_v41 = vsel %vm61_vm1, %v87_v33, 0.0  ;;  %v120_v42 = vsel %vm61_vm1, %v112_v34, 0.0  ;;  %v145_v43 = vsel %vm61_vm1, %v137_v35, 0.0  ;;  %v135_v30 = vld [vmem:[#allocation2 + $0x7] sm:$0x1] }
  0x95   :  { %v65_v44 = vrot.slane %v64_v36, 2  ;;  %v91_v45 = vrot.slane %v90_v37, 2  ;;  %v116_v46 = vrot.slane %v115_v38, 2  ;;  %v141_v47 = vrot.slane %v140_v39, 2 }
  0x96   :  { %v70_v48 = vrot.slane %v69_v40, 4  ;;  %v96_v49 = vrot.slane %v95_v41, 4  ;;  %v121_v50 = vrot.slane %v120_v42, 4  ;;  %v146_v51 = vrot.slane %v145_v43, 4 }
  0x97   :  { %v66_v52 = vadd.f32 %v65_v44, %v64_v36  ;;  %v92_v53 = vadd.f32 %v91_v45, %v90_v37  ;;  %v117_v54 = vadd.f32 %v116_v46, %v115_v38  ;;  %v142_v55 = vadd.f32 %v141_v47, %v140_v39  ;;  %v304_v39 = vld [vmem:[%s485_s2] ss:$0 sm:$0xff] }
  0x98   :  { %v71_v56 = vadd.f32 %v70_v48, %v69_v40  ;;  %v97_v57 = vadd.f32 %v96_v49, %v95_v41  ;;  %v122_v58 = vadd.f32 %v121_v50, %v120_v42  ;;  %v147_v59 = vadd.f32 %v146_v51, %v145_v43 }
  0x99   :  { %v67_v62 = vrot.slane %v66_v52, 1  ;;  %v93_v63 = vrot.slane %v92_v53, 1  ;;  %v118_v0 = vrot.slane %v117_v54, 1  ;;  %v143_v1 = vrot.slane %v142_v55, 1 }
  0x9a   :  { %v72_v6 = vrot.slane %v71_v56, 2  ;;  %v98_v7 = vrot.slane %v97_v57, 2  ;;  %v123_v8 = vrot.slane %v122_v58, 2  ;;  %v148_v9 = vrot.slane %v147_v59, 2 }
  0x9b   :  { %v68_v11 = vadd.f32 %v67_v62, %v66_v52  ;;  %v94_v12 = vadd.f32 %v93_v63, %v92_v53  ;;  %v119_v13 = vadd.f32 %v118_v0, %v117_v54  ;;  %v144_v14 = vadd.f32 %v143_v1, %v142_v55 }
  0x9c   :  { %v73_v15 = vadd.f32 %v72_v6, %v71_v56  ;;  %v99_v16 = vadd.f32 %v98_v7, %v97_v57  ;;  %v124_v17 = vadd.f32 %v123_v8, %v122_v58  ;;  %v149_v18 = vadd.f32 %v148_v9, %v147_v59 }
  0x9d   :  { %v76_v19 = vadd.f32 %v68_v11, %v57_v60  ;;  %v102_v20 = vadd.f32 %v94_v12, %v84_v61  ;;  %v127_v21 = vadd.f32 %v119_v13, %v109_v2  ;;  %v152_v22 = vadd.f32 %v144_v14, %v134_v10 }
  0x9e   :  { %v74_v23 = vrot.slane %v73_v15, 1  ;;  %v100_v24 = vrot.slane %v99_v16, 1  ;;  %v125_v25 = vrot.slane %v124_v17, 1  ;;  %v150_v26 = vrot.slane %v149_v18, 1 }
  0x9f   :  { %79 = vst.msk [vmem:[#allocation2] sm:$0x1] %vm78_vm2, %v76_v19  ;;  %104 = vst.msk [vmem:[#allocation2 + $0x1] sm:$0x1] %vm78_vm2, %v102_v20  ;;  %v195_v59 = vstv %s486_s3  ;;  %v377_v8 = vmov 0   ;;  %s378_s3 = smov [#allocation7]  }
  0xa0   :  { %129 = vst.msk [vmem:[#allocation2 + $0x2] sm:$0x1] %vm78_vm2, %v127_v21  ;;  %154 = vst.msk [vmem:[#allocation2 + $0x3] sm:$0x1] %vm78_vm2, %v152_v22  ;;  %v75_v31 = vadd.f32 %v74_v23, %v73_v15  ;;  %v101_v32 = vadd.f32 %v100_v24, %v99_v16  ;;  %v126_v33 = vadd.f32 %v125_v25, %v124_v17  ;;  %311 = vset.pattern.permute.xlu1 %v377_v8  ;;  %s295_s6 = sshll.u32 %s378_s3, 4  ;;  %s296_s6 = int_to_ptr.vmem [resolvable:$true] %s295_s6 }
  0xa1   :  { %v151_v34 = vadd.f32 %v150_v26, %v149_v18  ;;  %312 = vset.pattern.permute.xlu0 %v377_v8  ;;  %s347_s7 = scalar_lea.vmem %s296_s6, 32  ;;  %p352_p9 = scmp.lt.s32.totalorder %s296_s6, %s296_s6 }
  0xa2   :  { %v77_v35 = vadd.f32 %v75_v31, %v58_v27  ;;  %v103_v36 = vadd.f32 %v101_v32, %v85_v28  ;;  %v128_v37 = vadd.f32 %v126_v33, %v110_v29  ;;  %p348_p8 = scmp.ne.s32.totalorder %s296_s6, %s347_s7  ;;  %p353_p10 = scmp.lt.s32.totalorder %s347_s7, %s347_s7 }
  0xa3   :  { %v153_v38 = vadd.f32 %v151_v34, %v135_v30 }
  0xa4   :  { %80 = vst.msk [vmem:[#allocation2 + $0x4] sm:$0x1] %vm78_vm2, %v77_v35  ;;  %105 = vst.msk [vmem:[#allocation2 + $0x5] sm:$0x1] %vm78_vm2, %v103_v36  ;;  %p354_p11 = por %p353_p10, %p352_p9 }
  0xa5   :  { %130 = vst.msk [vmem:[#allocation2 + $0x6] sm:$0x1] %vm78_vm2, %v128_v37  ;;  %155 = vst.msk [vmem:[#allocation2 + $0x7] sm:$0x1] %vm78_vm2, %v153_v38 }
  0xa6   :  { %p355_p12 = pnand %p354_p11, %p348_p8 }
  0xa7   :  { %v159_v40 = vld [vmem:[#allocation2] sm:$0xf] }
  0xa8   :  { %v184_v41 = vmul.f32 %v304_v39, %v159_v40  ;;  %v161_v42 = vmul.f32 %v159_v40, %v159_v40 }
  0xaa   :  { %v186_v43 = vsel %vm37_vm0, %v184_v41, 0.0  ;;  %v164_v44 = vsel %vm37_vm0, %v161_v42, 0.0 }
  0xab   :  { %187 = vadd.xlane.f32.xlu0 %v186_v43  ;;  %165 = vadd.xlane.f32.xlu1 %v164_v44 }
  0xac   :  { %v160_v45 = vld [vmem:[#allocation2 + $0x4] sm:$0xf] }
  0xad   :  { %v162_v46 = vmul.f32 %v160_v45, %v160_v45  ;;  %v185_v48 = vmul.f32 %v304_v39, %v160_v45 }
  0xaf   :  { %v167_v47 = vsel %vm37_vm0, %v162_v46, 0.0  ;;  %v189_v49 = vsel %vm37_vm0, %v185_v48, 0.0 }
  0xb0   :  { %168 = vadd.xlane.f32.xlu1 %v167_v47 }
  0xb4   :  { %190 = vadd.xlane.f32.xlu1 %v189_v49 }
 0x138   :  { %v166_v50 = vpop.xlane.xlu1 %165  ;;  %v188_v57 = vpop.xlane.xlu0 %187 }
 0x139   :  { %v171_v51 = vmul.f32 0.03125, %v166_v50 }
 0x13b   :  { %v173_v52 = vadd.f32 1e-06, %v171_v51 }
 0x13d   :  { %313 = vrsqrt.f32 %v173_v52  ;;  %v169_v53 = vpop.xlane.xlu1 %168 }
 0x13e   :  { %v172_v54 = vmul.f32 0.03125, %v169_v53 }
 0x140   :  { %v174_v55 = vadd.f32 1e-06, %v172_v54 }
 0x141   :  { %v191_v61 = vpop.xlane.xlu1 %190 }
 0x142   :  { %315 = vrsqrt.f32 %v174_v55 }
 0x147   :  { %v314_v56 = vpop.eup %313 }
 0x148   :  { %v192_v58 = vmul.f32 %v314_v56, %v188_v57 }
 0x14a   :  { %v196_v62 = vadd.f32 %v195_v59, %v192_v58 }
 0x14c   :  { %v316_v60 = vpop.eup %315  ;;  %v205_v2 = vrot.slane %v196_v62, %v418_v4 }
 0x14d   :  { %v193_v63 = vmul.f32 %v316_v60, %v191_v61 }
 0x14f   :  { %v197_v0 = vadd.f32 %v195_v59, %v193_v63 }
 0x151   :  { %v209_v1 = vrot.slane %v197_v0, %v418_v4 }
 0x153   :  { %v211_v6 = vsel %vm210_vm3, %v209_v1, %v205_v2 }
 0x154   :  { %v214_v7 = vsel %vm213_vm4, %v211_v6, -inf }
 0x155   :  { %215 = vmax.xlane.f32.xlu1 %v214_v7 }
 0x1e2   :  { %v216_v9 = vpop.xlane.xlu1 %215 }
 0x1e3   :  { %v221_v10 = vrot.slane %v216_v9, %v416_v3  ;;  %v225_v11 = vrot.slane %v216_v9, %v420_v5 }
 0x1e5   :  { %v228_v12 = vsub.f32 %v196_v62, %v221_v10  ;;  %v229_v13 = vsub.f32 %v197_v0, %v225_v11 }
 0x1e7   :  { %v230_v14 = vmul.f32 1.442695, %v228_v12  ;;  %v232_v15 = vmul.f32 1.442695, %v229_v13 }
 0x1e9   :  { %317 = vpow2.f32 %v230_v14 }
 0x1ea   :  { %319 = vpow2.f32 %v232_v15 }
 0x1f3   :  { %v318_v16 = vpop.eup %317 }
 0x1f4   :  { %237 = vperm.xlu1 %311, %v318_v16   ;;  %v320_v17 = vpop.eup %319 }
 0x1f8   :  { %240 = vperm.xlu1 %311, %v320_v17  }
 0x273   :  { %v238_v18 = vpop.permute.xlu1 %237 }
 0x274   :  { %v245_v20 = vrot.slane %v238_v18, %v418_v4 }
 0x277   :  { %v241_v19 = vpop.permute.xlu1 %240 }
 0x278   :  { %v249_v21 = vrot.slane %v241_v19, %v418_v4 }
 0x27a   :  { %v250_v22 = vsel %vm210_vm3, %v249_v21, %v245_v20 }
 0x27b   :  { %v252_v23 = vsel %vm213_vm4, %v250_v22, 0.0 }
 0x27c   :  { %253 = vadd.xlane.f32.xlu1 %v252_v23 }
 0x309   :  { %v254_v24 = vpop.xlane.xlu1 %253 }
 0x30a   :  { %v259_v25 = vrot.slane %v254_v24, %v416_v3  ;;  %v263_v26 = vrot.slane %v254_v24, %v420_v5 }
 0x30c   :  { %321 = vrcp.f32 %v259_v25 }
 0x30d   :  { %323 = vrcp.f32 %v263_v26 }
 0x316   :  { %v322_v27 = vpop.eup %321 }
 0x317   :  { %v324_v28 = vpop.eup %323  ;;  %v267_v29 = vmul.f32 %v322_v27, %v318_v16 }
 0x318   :  { %v269_v30 = vmul.f32 %v324_v28, %v320_v17 }
 0x319   :  { %273 = vperm.xlu0 %312, %v267_v29  }
 0x31a   :  { %276 = vperm.xlu1 %311, %v269_v30  }
 0x398   :  { %v274_v31 = vpop.permute.xlu0 %273 }
 0x399   :  { %v277_v32 = vpop.permute.xlu1 %276  ;;  %v281_v33 = vrot.slane %v274_v31, %v418_v4 }
 0x39a   :  { %v285_v34 = vrot.slane %v277_v32, %v418_v4 }
 0x39c   :  { %v286_v3 = vsel %vm210_vm3, %v285_v34, %v281_v33 }
 0x39d   :  { %288 = vst.msk [vmem:[#allocation7] sm:$0x3] %vm213_vm4, %v286_v3 }
 0x39e   :  { %358 = shalt.err (!%p355_p12)
}
 0x39f   :  { %s359_s10 = scalar_lea.hbm %s487_s4, 32 }
 0x3a0   :  { %p360_p13 = scmp.ne.s32.totalorder %s487_s4, %s359_s10  ;;  %p363_p0 = scmp.lt.u32.totalorder %s359_s10, %s487_s4 }
 0x3a2   :  { %p365_p1 = pnand %p363_p0, %p360_p13 }
 0x3a4   :  { %368 = shalt.err (!%p365_p1)
}
 0x3a5   :  { %298 = dma.vmem_to_hbm [thread:$0]  %s296_s6, 32, %s487_s4, [#allocation6]  }
 0x3a6   :  { %371 = dma.done.wait [#allocation6], 32  }
 0x3a7   :  { %372 = vsyncadd [#allocation6], 4294967264 }
 0x3a8   :  { %302 = vsyncpa [#allocation5], 1 }
 0x3a9   :  { %303 = vsyncpa [#allocation6], 1 }

</bundles_post_ra>
